<compile_context>
chip_gen: v7x
topology: tpu7x:2x2x1
jax: 0.10.0
libtpu: 0.0.40
codegen_flags: <defaults>
</compile_context>

<pallas_src>
import functools

import jax
import jax.numpy as jnp
from jax.experimental import pallas as pl
from jax.experimental.pallas import tpu as pltpu

EPS = 1e-5


# ----------------------------------------------------------------------------
# Kernels
# ----------------------------------------------------------------------------
def _layer1_kernel(grid_ref, lat_ref, w1g_ref, y_ref, stats_ref):
    """conv1 for one (primitive, M-tile).

    grid_ref : (1, TM, 2)      bf16  per-primitive 2-D sample points
    lat_ref  : (1, 1, BT, C1)  f32   latent part of conv1 for this tile's rows
    w1g_ref  : (1, 2, C1)      bf16  conv1 weights of the 2 grid channels
    y_ref    : (1, TM, C1)     f32   staged pre-BN conv1 output
    stats_ref: (1, 2, C1)      f32   running [sum; sumsq] accumulated over M
    """
    f32 = jnp.float32
    m = pl.program_id(1)
    tm = grid_ref.shape[1]
    bt = lat_ref.shape[2]
    c1 = w1g_ref.shape[2]
    npp = tm // bt                                   # points per batch row

    # Grid part: 2 input channels -> two VPU rank-1 updates (cheaper than a
    # K=2 MXU matmul).
    g = grid_ref[0].astype(f32)                      # (TM, 2)
    w1g = w1g_ref[0].astype(f32)                     # (2, C1)
    y = g[:, 0:1] * w1g[0:1, :] + g[:, 1:2] * w1g[1:2, :]

    # Latent part: one row per batch element, broadcast over its Np points
    # (pure VPU add; no expander matmul, no per-point HBM replication).
    lat = lat_ref[0, 0]                              # (BT, C1)
    y = (y.reshape(bt, npp, c1) + lat[:, None, :]).reshape(tm, c1)
    y_ref[0] = y

    tile_stats = jnp.concatenate(
        [jnp.sum(y, axis=0, keepdims=True),
         jnp.sum(y * y, axis=0, keepdims=True)], axis=0)     # (2, C1)

    @pl.when(m == 0)
    def _():
        stats_ref[0] = tile_stats

    @pl.when(m > 0)
    def _():
        stats_ref[0] = stats_ref[0] + tile_stats


def _mid_kernel(y_ref, ss_ref, w_ref, o_ref, stats_ref):
    """BN(prev, precomputed scale/shift) + ReLU -> bf16 -> MXU conv -> stats.

    y_ref    : (1, TM, Cin)   f32   previous layer's staged pre-BN output
    ss_ref   : (1, 2, Cin)    f32   rows [scale; shift] of the previous BN
    w_ref    : (1, Cin, Cout) bf16
    o_ref    : (1, TM, Cout)  f32   staged pre-BN output of this layer
    stats_ref: (1, 2, Cout)   f32   running [sum; sumsq] accumulated over M
    """
    f32 = jnp.float32
    m = pl.program_id(1)
    ss = ss_ref[0]                                   # (2, Cin) f32
    # BN elementwise math in f32 (v5e has no bf16 VPU path); the relu'd
    # activation is cast to bf16 once so the MXU consumes bf16 directly.
    h = jnp.maximum(y_ref[0] * ss[0:1, :] + ss[1:2, :], 0.0).astype(jnp.bfloat16)
    y = jnp.dot(h, w_ref[0], preferred_element_type=f32)     # (TM, Cout)
    o_ref[0] = y

    tile_stats = jnp.concatenate(
        [jnp.sum(y, axis=0, keepdims=True),
         jnp.sum(y * y, axis=0, keepdims=True)], axis=0)     # (2, Cout)

    @pl.when(m == 0)
    def _():
        stats_ref[0] = tile_stats

    @pl.when(m > 0)
    def _():
        stats_ref[0] = stats_ref[0] + tile_stats


def _final_kernel(y_ref, ss_ref, w_ref, b_ref, o_ref):
    """bn3 + ReLU -> conv4 (+bias, out channels padded 3->8) -> tanh."""
    f32 = jnp.float32
    ss = ss_ref[0]                                   # (2, C3)
    h = jnp.maximum(y_ref[0] * ss[0:1, :] + ss[1:2, :], 0.0).astype(jnp.bfloat16)
    y = jnp.dot(h, w_ref[0], preferred_element_type=f32) + b_ref[0]
    o_ref[0] = jnp.tanh(y)


# ----------------------------------------------------------------------------
# Wrapper helpers
# ----------------------------------------------------------------------------
def _pick_vmem_limit():
    """Per-generation scoped-VMEM ceiling: ~96 MiB on 128-MiB parts (v5e/v6e),
    48 MiB on v7x (64 MiB physical) and unknown parts."""
    try:
        kind = jax.devices()[0].device_kind.lower()
    except Exception:
        kind = ""
    if "v5" in kind or "v6" in kind:
        return 96 * 1024 * 1024
    return 48 * 1024 * 1024


def _pick_tile(M, B, Np, tile_m, target=512):
    """Rows per M-tile: a multiple of Np (so each tile covers whole batch
    rows), dividing M, ~512 by default (a multiple of 256 for the v6e/v7x
    256-wide MXU and of 128 for v5e whenever Np allows)."""
    if tile_m is not None:
        assert tile_m % Np == 0 and M % tile_m == 0, (tile_m, Np, M)
        bt = tile_m // Np
        assert B % bt == 0, (B, bt)
        tm = tile_m
    else:
        bt = max(1, min(B, target // max(Np, 1)))
        while B % bt:
            bt -= 1
        tm = bt * Np
    if tm != M and tm % 8 != 0:
        tm, bt = M, B            # keep blocks (8,128)-tile aligned
    return tm, bt


def _bn_scale_shift(stats, gamma, beta, m_total):
    """Accumulated per-channel [sum; sumsq] -> training-mode BN scale/shift.

    The conv bias torch adds before BN is cancelled exactly by the mean
    subtraction, so it was never added.  Variance is clamped at 0 (single-pass
    E[y^2]-mu^2 can go slightly negative from f32 cancellation)."""
    p = stats.shape[0]
    inv = 1.0 / float(m_total)
    mu = stats[:, 0, :] * inv
    var = jnp.maximum(stats[:, 1, :] * inv - mu * mu, 0.0)
    scale = gamma.reshape(p, -1) * jax.lax.rsqrt(var + EPS)
    shift = beta.reshape(p, -1) - mu * scale
    return jnp.stack([scale, shift], axis=1).astype(jnp.float32)   # (P, 2, C)


# ----------------------------------------------------------------------------
# Forward
# ----------------------------------------------------------------------------
def msn_decoder_forward(x, rand_grid, params, *, num_points, n_primitives,
                        tile_m=None):
    """x: (B, bottleneck)  rand_grid: (P, B, Np, 2) -> ((B, num_points, 3), loss)."""
    B, bottleneck = x.shape
    P = n_primitives
    Np = num_points // n_primitives
    M = B * Np

    (w1, _b1, g1, be1, w2, _b2, g2, be2, w3, _b3, g3, be3, w4, b4) = params
    C1, C2, C3 = w1.shape[2], w2.shape[2], w3.shape[2]
    N4 = 8                                  # conv4 out-channels padded 3 -> 8

    f32, bf16 = jnp.float32, jnp.bfloat16

    TM, BT = _pick_tile(M, B, Np, tile_m)
    MT = M // TM

    # conv1 split: the 2 grid input channels are applied per point in-kernel;
    # the latent contribution is constant over the Np points of a batch
    # element -> compute it once per (primitive, batch row) here.
    w1g = w1[:, :2, :].astype(bf16)                        # (P, 2, C1)
    w1x = w1[:, 2:, :].astype(bf16)                        # (P, bottleneck, C1)
    lat = jnp.einsum('bc,pcd->pbd', x.astype(bf16), w1x,
                     preferred_element_type=f32)           # (P, B, C1)
    lat4 = lat.reshape(P, MT, BT, C1)                      # per-tile batch rows

    grid2 = rand_grid.reshape(P, M, 2).astype(bf16)        # (P, M, 2)

    w2b, w3b = w2.astype(bf16), w3.astype(bf16)
    w4p = jnp.pad(w4, ((0, 0), (0, 0), (0, N4 - 3))).astype(bf16)   # (P, C3, 8)
    b4p = jnp.pad(b4, ((0, 0), (0, 0), (0, N4 - 3))).astype(f32)    # (P, 1, 8)

    cparams = pltpu.CompilerParams(
        dimension_semantics=("parallel", "arbitrary"),
        vmem_limit_bytes=_pick_vmem_limit())

    def tile_spec(c):                       # blocks tiled along the M axis
        return pl.BlockSpec((1, TM, c), lambda p, m: (p, m, 0))

    def prim_spec(d0, d1):                  # blocks resident across M-tiles
        return pl.BlockSpec((1, d0, d1), lambda p, m: (p, 0, 0))

    # --- layer 1: conv1 (grid rank-1 + latent broadcast) + stats -------------
    y1, s1 = pl.pallas_call(
        _layer1_kernel,
        out_shape=(jax.ShapeDtypeStruct((P, M, C1), f32),
                   jax.ShapeDtypeStruct((P, 2, C1), f32)),
        grid_spec=pltpu.PrefetchScalarGridSpec(
            num_scalar_prefetch=0, grid=(P, MT),
            in_specs=[
                tile_spec(2),
                pl.BlockSpec((1, 1, BT, C1), lambda p, m: (p, m, 0, 0)),
                prim_spec(2, C1),
            ],
            out_specs=(tile_spec(C1), prim_spec(2, C1))),
        compiler_params=cparams,
    )(grid2, lat4, w1g)
    ss1 = _bn_scale_shift(s1, g1, be1, M)

    # --- layers 2 / 3: previous BN+ReLU fused with this layer's conv ---------
    def mid_layer(y_prev, ss_prev, w, cin, cout):
        return pl.pallas_call(
            _mid_kernel,
            out_shape=(jax.ShapeDtypeStruct((P, M, cout), f32),
                       jax.ShapeDtypeStruct((P, 2, cout), f32)),
            grid_spec=pltpu.PrefetchScalarGridSpec(
                num_scalar_prefetch=0, grid=(P, MT),
                in_specs=[tile_spec(cin), prim_spec(2, cin),
                          prim_spec(cin, cout)],
                out_specs=(tile_spec(cout), prim_spec(2, cout))),
            compiler_params=cparams,
        )(y_prev, ss_prev, w)

    y2, s2 = mid_layer(y1, ss1, w2b, C1, C2)
    ss2 = _bn_scale_shift(s2, g2, be2, M)
    y3, s3 = mid_layer(y2, ss2, w3b, C2, C3)
    ss3 = _bn_scale_shift(s3, g3, be3, M)

    # --- layer 4: bn3 + ReLU -> conv4 (+bias) -> tanh -------------------------
    out = pl.pallas_call(
        _final_kernel,
        out_shape=jax.ShapeDtypeStruct((P, M, N4), f32),
        grid_spec=pltpu.PrefetchScalarGridSpec(
            num_scalar_prefetch=0, grid=(P, MT),
            in_specs=[tile_spec(C3), prim_spec(2, C3), prim_spec(C3, N4),
                      prim_spec(1, N4)],
            out_specs=tile_spec(N4)),
        compiler_params=cparams,
    )(y3, ss3, w4p, b4p)

    # Drop the padded output lanes; torch.cat(patch_outs, dim=2).transpose(1,2)
    # orders points primitive-major.
    recon = out[:, :, :3].reshape(P, B, Np, 3).transpose(1, 0, 2, 3)
    recon = recon.reshape(B, P * Np, 3)

    # TODO(synk): expansionPenaltyModule (MST-based CUDA op) has no clean
    # Pallas equivalent; the reference returns exactly 0 for n_primitives < 16,
    # which holds for this configuration.
    loss_mst = jnp.zeros((), f32)
    return recon, loss_mst


# ----------------------------------------------------------------------------
# Synthetic parameters + pure-JAX reference
# ----------------------------------------------------------------------------
def make_params(key, bottleneck, n_primitives):
    """Synthetic per-primitive parameters mirroring PointGenCon's layout."""
    C0 = bottleneck + 2
    C1, C2, C3 = C0, C0 // 2, C0 // 4
    dims = [(C0, C1), (C1, C2), (C2, C3), (C3, 3)]
    keys = jax.random.split(key, 16)
    params = []
    ki = 0
    for li, (cin, cout) in enumerate(dims):
        scale = 1.0 / jnp.sqrt(jnp.float32(cin))
        w = jax.random.uniform(keys[ki], (n_primitives, cin, cout), jnp.float32,
                               -scale, scale); ki += 1
        b = jax.random.uniform(keys[ki], (n_primitives, 1, cout), jnp.float32,
                               -scale, scale); ki += 1
        params.append(w)
        params.append(b)
        if li < 3:  # conv1..conv3 are followed by BatchNorm
            gamma = jax.random.uniform(keys[ki], (n_primitives, 1, cout),
                                       jnp.float32, 0.5, 1.5); ki += 1
            beta = 0.1 * jax.random.normal(keys[ki], (n_primitives, 1, cout),
                                           jnp.float32); ki += 1
            params.append(gamma)
            params.append(beta)
    return tuple(params)


def reference_forward(x, rand_grid, params, *, num_points, n_primitives):
    """Pure-JAX reference faithful to the PyTorch forward (concat patch + convs).

    Matmul inputs are cast to bf16 with f32 accumulation to mirror the kernel's
    MXU precision; conv biases b1..b3 are included (training-mode BN cancels
    them)."""
    B, bottleneck = x.shape
    Np = num_points // n_primitives
    C0 = bottleneck + 2
    bf16 = jnp.bfloat16

    latent = jnp.broadcast_to(x[None, :, None, :],
                              (n_primitives, B, Np, bottleneck))
    patch = jnp.concatenate([rand_grid, latent], axis=-1).reshape(
        n_primitives, B * Np, C0)

    (w1, b1, g1, be1, w2, b2, g2, be2, w3, b3, g3, be3, w4, b4) = params

    def conv(h, w, b):
        return jnp.einsum("pmc,pcd->pmd", h.astype(bf16), w.astype(bf16),
                          preferred_element_type=jnp.float32) + b

    def bn_relu(y, g, be):
        mu = jnp.mean(y, axis=1, keepdims=True)
        var = jnp.mean(jnp.square(y - mu), axis=1, keepdims=True)
        return jnp.maximum(g * (y - mu) * jax.lax.rsqrt(var + EPS) + be, 0.0)

    h = bn_relu(conv(patch, w1, b1), g1, be1)
    h = bn_relu(conv(h, w2, b2), g2, be2)
    h = bn_relu(conv(h, w3, b3), g3, be3)
    out = jnp.tanh(conv(h, w4, b4))
    recon = out.reshape(n_primitives, B, Np, 3).transpose(1, 0, 2, 3)
    return recon.reshape(B, n_primitives * Np, 3)


# ----------------------------------------------------------------------------
# Demo / correctness check
# ----------------------------------------------------------------------------
if __name__ == "__main__":
    # Small, MSN-consistent shapes: latent (B, bottleneck), decoder input
    # channels = bottleneck + 2.
    B = 2
    bottleneck = 30          # -> C0 = 32, C1 = 32, C2 = 16, C3 = 8
    num_points = 32
    n_primitives = 4         # < 16, so loss_mst == 0 per the reference module
    Np = num_points // n_primitives

    root = jax.random.PRNGKey(0)
    kx, kgrid, kparams = jax.random.split(root, 3)

    x = jax.random.normal(kx, (B, bottleneck), jnp.float32)
    rand_grid = jax.random.uniform(kgrid, (n_primitives, B, Np, 2), jnp.float32)
    params = make_params(kparams, bottleneck, n_primitives)

    # tile_m=8 -> 2 M-tiles per primitive, exercising the accumulated-stats path.
    fwd = functools.partial(msn_decoder_forward, num_points=num_points,
                            n_primitives=n_primitives, tile_m=8)
    recon, loss_mst = fwd(x, rand_grid, params)
    recon = jax.block_until_ready(recon)
    loss_mst = jax.block_until_ready(loss_mst)

    assert recon.shape == (B, num_points, 3), recon.shape
    assert recon.dtype == jnp.float32

    ref = reference_forward(x, rand_grid, params,
                            num_points=num_points, n_primitives=n_primitives)
    ref = jax.block_until_ready(ref)
    max_err = float(jnp.max(jnp.abs(recon - ref)))
    assert jnp.allclose(recon, ref, rtol=1e-2, atol=1e-2), max_err

    print("KERNEL_OK")
</pallas_src>

<mosaic_0001>
module attributes {stable_mosaic.version = 11 : i64} {
  func.func @_layer1_kernel(%arg0: i32, %arg1: i32, %arg2: memref<1x8x2xbf16, #tpu.memory_space<vmem>>, %arg3: memref<1x1x1x32xf32, #tpu.memory_space<vmem>>, %arg4: memref<1x2x32xbf16, #tpu.memory_space<vmem>>, %arg5: memref<1x8x32xf32, #tpu.memory_space<vmem>>, %arg6: memref<1x2x32xf32, #tpu.memory_space<vmem>>) attributes {dimension_semantics = [#tpu.dimension_semantics<parallel>, #tpu.dimension_semantics<arbitrary>], iteration_bounds = array<i64: 4, 2>, scalar_prefetch = 0 : i64, scratch_operands = 0 : i64, tpu.core_type = #tpu.core_type<tc>, window_params = [{transform_indices = @transform_0, window_bounds = array<i64: 1, 8, 2>}, {transform_indices = @transform_1, window_bounds = array<i64: 1, 1, 1, 32>}, {transform_indices = @transform_2, window_bounds = array<i64: 1, 2, 32>}, {transform_indices = @transform_3, window_bounds = array<i64: 1, 8, 32>}, {transform_indices = @transform_4, window_bounds = array<i64: 1, 2, 32>}]} {
    %c0 = arith.constant 0 : index
    %c0_0 = arith.constant 0 : index
    %c0_1 = arith.constant 0 : index
    %0 = vector.load %arg2[%c0, %c0_0, %c0_1] : memref<1x8x2xbf16, #tpu.memory_space<vmem>>, vector<1x8x2xbf16>
    %1 = vector.shape_cast %0 : vector<1x8x2xbf16> to vector<8x2xbf16>
    %2 = arith.extf %1 : vector<8x2xbf16> to vector<8x2xf32>
    %c0_2 = arith.constant 0 : index
    %c0_3 = arith.constant 0 : index
    %c0_4 = arith.constant 0 : index
    %3 = vector.load %arg4[%c0_2, %c0_3, %c0_4] : memref<1x2x32xbf16, #tpu.memory_space<vmem>>, vector<1x2x32xbf16>
    %4 = vector.shape_cast %3 : vector<1x2x32xbf16> to vector<2x32xbf16>
    %5 = arith.extf %4 : vector<2x32xbf16> to vector<2x32xf32>
    %6 = vector.extract_strided_slice %2 {offsets = [0, 0], sizes = [8, 1], strides = [1, 1]} : vector<8x2xf32> to vector<8x1xf32>
    %7 = vector.extract_strided_slice %5 {offsets = [0, 0], sizes = [1, 32], strides = [1, 1]} : vector<2x32xf32> to vector<1x32xf32>
    %8 = vector.broadcast %6 : vector<8x1xf32> to vector<8x32xf32>
    %9 = vector.broadcast %7 : vector<1x32xf32> to vector<8x32xf32>
    %10 = arith.mulf %8, %9 : vector<8x32xf32>
    %11 = vector.extract_strided_slice %2 {offsets = [0, 1], sizes = [8, 1], strides = [1, 1]} : vector<8x2xf32> to vector<8x1xf32>
    %12 = vector.extract_strided_slice %5 {offsets = [1, 0], sizes = [1, 32], strides = [1, 1]} : vector<2x32xf32> to vector<1x32xf32>
    %13 = vector.broadcast %11 : vector<8x1xf32> to vector<8x32xf32>
    %14 = vector.broadcast %12 : vector<1x32xf32> to vector<8x32xf32>
    %15 = arith.mulf %13, %14 : vector<8x32xf32>
    %16 = arith.addf %10, %15 : vector<8x32xf32>
    %c0_5 = arith.constant 0 : index
    %c0_6 = arith.constant 0 : index
    %c0_7 = arith.constant 0 : index
    %c0_8 = arith.constant 0 : index
    %17 = vector.load %arg3[%c0_5, %c0_6, %c0_7, %c0_8] : memref<1x1x1x32xf32, #tpu.memory_space<vmem>>, vector<1x1x1x32xf32>
    %18 = vector.shape_cast %17 : vector<1x1x1x32xf32> to vector<1x32xf32>
    %19 = vector.shape_cast %16 : vector<8x32xf32> to vector<1x8x32xf32>
    %20 = vector.shape_cast %18 : vector<1x32xf32> to vector<1x1x32xf32>
    %21 = vector.broadcast %20 : vector<1x1x32xf32> to vector<1x8x32xf32>
    %22 = arith.addf %19, %21 : vector<1x8x32xf32>
    %23 = vector.shape_cast %22 : vector<1x8x32xf32> to vector<8x32xf32>
    %c0_9 = arith.constant 0 : index
    %c0_10 = arith.constant 0 : index
    %c0_11 = arith.constant 0 : index
    %24 = vector.load %arg5[%c0_9, %c0_10, %c0_11] : memref<1x8x32xf32, #tpu.memory_space<vmem>>, vector<1x8x32xf32>
    %25 = vector.shape_cast %24 : vector<1x8x32xf32> to vector<8x32xf32>
    %26 = vector.shape_cast %23 : vector<8x32xf32> to vector<1x8x32xf32>
    tpu.vector_store %arg5[%c0_9, %c0_10, %c0_11], %26 {strides = array<i32>} : memref<1x8x32xf32, #tpu.memory_space<vmem>>, vector<1x8x32xf32>,
    %cst = arith.constant dense<0.000000e+00> : vector<32xf32>
    %27 = vector.multi_reduction <add>, %23, %cst [0] : vector<8x32xf32> to vector<32xf32>
    %28 = vector.shape_cast %27 : vector<32xf32> to vector<1x32xf32>
    %29 = arith.mulf %23, %23 : vector<8x32xf32>
    %cst_12 = arith.constant dense<0.000000e+00> : vector<32xf32>
    %30 = vector.multi_reduction <add>, %29, %cst_12 [0] : vector<8x32xf32> to vector<32xf32>
    %31 = vector.shape_cast %30 : vector<32xf32> to vector<1x32xf32>
    %32 = tpu.concatenate %28, %31 in 0 : vector<1x32xf32>, vector<1x32xf32> -> vector<2x32xf32>
    %c0_i32 = arith.constant 0 : i32
    %33 = arith.cmpi eq, %arg1, %c0_i32 : i32
    %34 = arith.extui %33 : i1 to i32
    %c0_i32_13 = arith.constant 0 : i32
    %35 = arith.cmpi ne, %34, %c0_i32_13 : i32
    scf.if %35 {
      %c0_16 = arith.constant 0 : index
      %c0_17 = arith.constant 0 : index
      %c0_18 = arith.constant 0 : index
      %39 = vector.load %arg6[%c0_16, %c0_17, %c0_18] : memref<1x2x32xf32, #tpu.memory_space<vmem>>, vector<1x2x32xf32>
      %40 = vector.shape_cast %39 : vector<1x2x32xf32> to vector<2x32xf32>
      %41 = vector.shape_cast %32 : vector<2x32xf32> to vector<1x2x32xf32>
      tpu.vector_store %arg6[%c0_16, %c0_17, %c0_18], %41 {strides = array<i32>} : memref<1x2x32xf32, #tpu.memory_space<vmem>>, vector<1x2x32xf32>,
    } else {
    }
    %c0_i32_14 = arith.constant 0 : i32
    %36 = arith.cmpi sgt, %arg1, %c0_i32_14 : i32
    %37 = arith.extui %36 : i1 to i32
    %c0_i32_15 = arith.constant 0 : i32
    %38 = arith.cmpi ne, %37, %c0_i32_15 : i32
    scf.if %38 {
      %c0_16 = arith.constant 0 : index
      %c0_17 = arith.constant 0 : index
      %c0_18 = arith.constant 0 : index
      %39 = vector.load %arg6[%c0_16, %c0_17, %c0_18] : memref<1x2x32xf32, #tpu.memory_space<vmem>>, vector<1x2x32xf32>
      %40 = vector.shape_cast %39 : vector<1x2x32xf32> to vector<2x32xf32>
      %41 = arith.addf %40, %32 : vector<2x32xf32>
      %c0_19 = arith.constant 0 : index
      %c0_20 = arith.constant 0 : index
      %c0_21 = arith.constant 0 : index
      %42 = vector.load %arg6[%c0_19, %c0_20, %c0_21] : memref<1x2x32xf32, #tpu.memory_space<vmem>>, vector<1x2x32xf32>
      %43 = vector.shape_cast %42 : vector<1x2x32xf32> to vector<2x32xf32>
      %44 = vector.shape_cast %41 : vector<2x32xf32> to vector<1x2x32xf32>
      tpu.vector_store %arg6[%c0_19, %c0_20, %c0_21], %44 {strides = array<i32>} : memref<1x2x32xf32, #tpu.memory_space<vmem>>, vector<1x2x32xf32>,
    } else {
    }
    return
  }
  func.func @transform_0(%arg0: i32, %arg1: i32) -> (i32, i32, i32) {
    %c0_i32 = arith.constant 0 : i32
    %c0_i32_0 = arith.constant 0 : i32
    return %arg0, %arg1, %c0_i32 : i32, i32, i32
  }
  func.func @transform_1(%arg0: i32, %arg1: i32) -> (i32, i32, i32, i32) {
    %c0_i32 = arith.constant 0 : i32
    %c0_i32_0 = arith.constant 0 : i32
    %c0_i32_1 = arith.constant 0 : i32
    return %arg0, %arg1, %c0_i32, %c0_i32_0 : i32, i32, i32, i32
  }
  func.func @transform_2(%arg0: i32, %arg1: i32) -> (i32, i32, i32) {
    %c0_i32 = arith.constant 0 : i32
    %c0_i32_0 = arith.constant 0 : i32
    %c0_i32_1 = arith.constant 0 : i32
    return %arg0, %c0_i32, %c0_i32_0 : i32, i32, i32
  }
  func.func @transform_3(%arg0: i32, %arg1: i32) -> (i32, i32, i32) {
    %c0_i32 = arith.constant 0 : i32
    %c0_i32_0 = arith.constant 0 : i32
    return %arg0, %arg1, %c0_i32 : i32, i32, i32
  }
  func.func @transform_4(%arg0: i32, %arg1: i32) -> (i32, i32, i32) {
    %c0_i32 = arith.constant 0 : i32
    %c0_i32_0 = arith.constant 0 : i32
    %c0_i32_1 = arith.constant 0 : i32
    return %arg0, %c0_i32, %c0_i32_0 : i32, i32, i32
  }
}

</mosaic_0001>

<bundles_post_ra>
// kernel: tpu_custom_call.1
= control target key start
LH: loop header
LB: loop body
LE: loop exit
PB: predicated region body
PF: predicated region fallthrough
CT: control target
= control target key end

     0   :  { %s1057_s0 = inlined_call_operand.vmem [shape: bf16[4,16,2], index: 0, kind: input, shape index: {}]   ;;  %s1058_s1 = inlined_call_operand.vmem [shape: f32[4,2,1,32], index: 1, kind: input, shape index: {}]   ;;  %s1059_s2 = inlined_call_operand.vmem [shape: bf16[4,2,32], index: 2, kind: input, shape index: {}]   ;;  %s1060_s3 = inlined_call_operand.hbm [shape: f32[4,16,32], index: 3, kind: output, shape index: {0}]   ;;  %s1061_s4 = inlined_call_operand.hbm [shape: f32[4,2,32], index: 4, kind: output, shape index: {1}]  }
   0x1   :  { %1067 = sst [smem:[#allocation12_spill]] %s1057_s0 }
   0x2   :  { %1068 = sst [smem:[#allocation13_spill]] %s1058_s1 }
   0x3   :  { %10 = vsyncpa [#allocation3], 0 }
   0x4   :  { %12 = vsyncpa [#allocation3 + $0x1], 0 }
   0x5   :  { %13 = vsyncpa [#allocation5], 0 }
   0x6   :  { %15 = vsyncpa [#allocation5 + $0x1], 0  ;;  %s812_s15 = smov 0   ;;  %s814_s16 = smov 0  }
   0x7   :  { %s816_s17 = smov 0   ;;  %s818_s18 = smov 0  }
   0x8   :  { %s820_s19 = smov 0   ;;  %s822_s20 = smov 0  }
   0x9   :  { %s824_s21 = smov 0   ;;  %s826_s22 = smov 0  }
   0xa   :  { %s828_s23 = smov 0   ;;  %s830_s24 = smov 0  }
   0xb   :  { %s832_s25 = smov 0  }
   0xc LB: > { %1069 = sst [smem:[#allocation8_spill]] %s773_s23  ;;  %s507_s26 = sadd.s32 4294967295, %s781_s25   ;;  %s781_s25 = sphi %s832_s25, %s21_s25   ;;  %s777_s24 = sphi %s830_s24, %s1087_s24   ;;  %s773_s23 = sphi %s828_s23, %s1086_s23   ;;  %s769_s22 = sphi %s826_s22, %s1085_s22   ;;  %s765_s21 = sphi %s824_s21, %s1084_s21   ;;  %s761_s20 = sphi %s822_s20, %s1093_s20   ;;  %s757_s19 = sphi %s820_s19, %s1092_s19   ;;  %s753_s18 = sphi %s818_s18, %s1091_s18   ;;  %s749_s17 = sphi %s816_s17, %s1090_s17   ;;  %s745_s16 = sphi %s814_s16, %s1089_s16   ;;  %s741_s15 = sphi %s812_s15, %s1088_s15  }
   0xd   : > { %1070 = sst [smem:[#allocation9_spill]] %s777_s24  ;;  %s508_s27 = sadd.s32 4294967294, %s781_s25  }
   0xe   : > { %s30_s28 = sadd.s32 1, %s773_s23  ;;  %s33_s29 = sadd.s32 1, %s777_s24 }
   0xf   : > { %p31_p0 = scmp.ge.s32.totalorder %s30_s28, 2  ;;  %s124_s30 = sadd.s32 1, %s761_s20 }
  0x10   : > { %p134_p1 = scmp.ne.s32.totalorder %s761_s20, %s757_s19  ;;  %p874_p2 = scmp.eq.s32.totalorder %s507_s26, 7 }
  0x11   : > { %s1095_s28 = smov (%p31_p0, %s30_s28), 0  ;;  %s1097_s29 = smov (!%p31_p0, %s33_s29), %s777_s24 }
  0x12   : > { %1072 = sst [smem:[#allocation10_spill]] %s1095_s28  ;;  %s120_s6 = ssub.s32 %s773_s23, %s1095_s28 }
  0x13   : > { %p885_p3 = por %p874_p2, %p134_p1  ;;  %p35_p4 = scmp.ge.s32.totalorder %s1097_s29, 4 }
  0x14   : > { %p140_p5 = scmp.ne.s32.totalorder %s757_s19, %s753_s18  ;;  %p891_p6 = scmp.eq.s32.totalorder %s508_s27, 7 }
  0x15   : > { %s150_s9 = sadd.s32 1, %s749_s17  ;;  %s1099_s29 = smov (%p35_p4, %s1097_s29), 0 }
  0x16   : > { %1075 = sst [smem:[#allocation11_spill]] %s1099_s29  ;;  %p900_p7 = por %p891_p6, %p140_p5 }
  0x17   : > { %p160_p8 = scmp.ne.s32.totalorder %s749_s17, %s745_s16  ;;  %s119_s11 = ssub.s32 %s777_s24, %s1099_s29 }
  0x18   : > { %s1076_s10 = scalar_select %p900_p7, 1, 0 }
  0x19   : > { %p166_p9 = scmp.ne.s32.totalorder %s745_s16, %s741_s15  ;;  %s121_s12 = sor.u32 %s120_s6, %s119_s11 }
  0x1a   : > { %p148_p10 = scmp.eq.s32.totalorder %s119_s11, 0  ;;  %p122_p11 = scmp.eq.s32.totalorder %s121_s12, 0 }
  0x1b   : > { %p912_p12 = por %p160_p8, %p874_p2  ;;  %p924_p13 = por %p166_p9, %p891_p6 }
  0x1c   : > { %s917_s14 = scalar_select %p148_p10, %s749_s17, %s150_s9  }
  0x1d   : > { %s920_s26 = scalar_select %p122_p11, %s761_s20, %s124_s30  }
  0x1e   : > { %s1078_s27 = scalar_select %p924_p13, 1, 0 }
  0x1f   : > { %p511_p0 = scmp.ge.s32.totalorder %s781_s25, 1  ;;  %p212_p1 = scmp.lt.s32.totalorder %s781_s25, 9 }
  0x21   : > { %p213_p4 = pnand %p511_p0, %p212_p1 }
  0x22   : > { %p256_p2 = scmp.lt.s32.totalorder (!%p213_p4), %s769_s22, 3  ;;  %p258_p5 = scmp.lt.s32.totalorder (!%p213_p4), %s765_s21, 1  ;;  %v783_v0 = vmov (!%p213_p4), 0   ;;  %v784_v3 = vmov (!%p213_p4), 1   ;;  %v283_v4 = vlaneseq (!%p213_p4)  ;;  %vm306_vm0 = vcmask (!%p213_p4), 261120  }
  0x23   : > { %216 = sbr.rel (%p213_p4) target bundleno = 268 (0x10c), region = 32  ;;  %629 = vset.pattern.permute.xlu0 (!%p213_p4), %v783_v0  ;;  %s1079_s0 = sld [smem:[#allocation12_spill]] (!%p213_p4)  ;;  %vm323_vm1 = vcmask (!%p213_p4), 1040384  }
  0x24   : > { %s1066_s28 = sand.u32 (!%p213_p4), 1, %s745_s16   ;;  %v284_v5 = vshrl.u32 (!%p213_p4), %v283_v4, 7  ;;  %s1080_s1 = sld [smem:[#allocation13_spill]] (!%p213_p4) }
  0x25   : > { %s940_s24 = sshll.u32 (!%p213_p4), %s1066_s28, 1  ;;  %p518_p6 = scmp.ne.s32.totalorder (!%p213_p4), %s765_s21, 0 }
  0x26   : > { %v285_v8 = vsub.s32 (!%p213_p4), 0, %v284_v5  ;;  %v294_v9 = vsub.s32 (!%p213_p4), 1, %v284_v5 }
  0x2a   : > { %s257_s30 = scalar_select %p256_p2, %s769_s22, 3 }
  0x2b   : > { %s259_s5 = scalar_select %p258_p5, %s765_s21, 1 }
  0x2c   : > { %s514_s6 = sshll.u32 %s257_s30, 1  ;;  %vm329_vm2 = vcmask (!%p518_p6), 254976  }
  0x2d   : > { %s261_s8 = sadd.s32 %s514_s6, %s259_s5  ;;  %s273_s6 = scalar_lea.vmem %s1059_s2, %s257_s30 }
  0x2e   : > { %s515_s9 = sshll.u32 %s261_s8, 2  ;;  %v276_v6 = vld [vmem:[%s273_s6] sm:$0x1]  ;;  %s270_s12 = scalar_lea.vmem %s1080_s1, %s261_s8 }
  0x2f   : > { %s263_s29 = scalar_lea.vmem %s1079_s0, %s515_s9  ;;  %v277_v7 = vunpack.c.l.bf16 %v276_v6  ;;  %v517_v16 = vld [vmem:[%s270_s12] ss:$0 sm:$0xff]  ;;  %s957_s30 = scalar_lea.vmem [#allocation4], %s940_s24 }
  0x30   : > { %v274_v1 = vld [vmem:[%s263_s29] sm:$0xf]  ;;  %s246_s29 = sand.u32 1, %s757_s19  }
  0x31   : > { %v275_v2 = vunpack.c.l.bf16 %v274_v1  ;;  %v286_v11 = vrot.slane %v277_v7, %v285_v8  ;;  %v295_v12 = vrot.slane %v277_v7, %v294_v9  ;;  %s951_s28 = sshll.u32 %s246_s29, 3 }
  0x32   : > { %s248_s23 = scalar_lea.vmem [#allocation2], %s951_s28 }
  0x33   : > { %280 = vperm.xlu0 %629, %v275_v2  }
  0x37   : > { %630 = vset.pattern.permute.xlu0 %v784_v3 }
  0x38   : > { %289 = vperm.xlu0 %630, %v275_v2  }
  0xb2   : > { %v281_v10 = vpop.permute.xlu0 %280 }
  0xb3   : > { %v287_v14 = vmul.f32 %v286_v11, %v281_v10 }
  0xb7   : > { %v290_v13 = vpop.permute.xlu0 %289 }
  0xb8   : > { %v296_v15 = vmul.f32 %v295_v12, %v290_v13 }
  0xba   : > { %v297_v17 = vadd.f32 %v296_v15, %v287_v14 }
  0xbc   : > { %v305_v18 = vadd.f32 %v517_v16, %v297_v17 }
  0xbe   : > { %307 = vst.msk [vmem:[%s248_s23] sm:$0xff] %vm306_vm0, %v305_v18  ;;  %v308_v19 = vsel %vm306_vm0, %v305_v18, 0.0  ;;  %v315_v20 = vmul.f32 %v305_v18, %v305_v18 }
  0xbf   : > { %v309_v21 = vrot.slane %v308_v19, 4 }
  0xc0   : > { %v316_v22 = vsel %vm306_vm0, %v315_v20, 0.0 }
  0xc1   : > { %v310_v23 = vadd.f32 %v309_v21, %v308_v19  ;;  %v317_v24 = vrot.slane %v316_v22, 4 }
  0xc3   : > { %v311_v25 = vrot.slane %v310_v23, 2  ;;  %v318_v26 = vadd.f32 %v317_v24, %v316_v22 }
  0xc5   : > { %v312_v27 = vadd.f32 %v311_v25, %v310_v23  ;;  %v319_v28 = vrot.slane %v318_v26, 2 }
  0xc7   : > { %v313_v29 = vrot.slane %v312_v27, 1  ;;  %v320_v30 = vadd.f32 %v319_v28, %v318_v26  ;;  %328 = sbr.rel (%p518_p6) target bundleno = 207 (0xcf), region = 36 }
  0xc9   : > { %v321_v31 = vrot.slane %v320_v30, 1  ;;  %v314_v32 = vadd.f32 %v313_v29, %v312_v27 }
  0xcb   : > { %v322_v33 = vadd.f32 %v321_v31, %v320_v30 }
  0xcd   : > { %v324_v34 = vsel %vm323_vm1, %v314_v32, %v322_v33 }
  0xce   : > { %330 = vst.msk [vmem:[%s957_s30] sm:$0x3] %vm329_vm2, %v324_v34 }
  0xcf PF: > { %p519_p8 = scmp.le.s32.totalorder %s765_s21, 0 }
  0xd0   : > { %vm337_vm3 = vcmask (!%p519_p8), 254976  }
  0xd1   : > { %334 = sbr.rel (%p519_p8) target bundleno = 217 (0xd9), region = 40 }
  0xd5   : > { %v335_v35 = vld [vmem:[%s957_s30] sm:$0x3] (!%p519_p8) }
  0xd6   : > { %v336_v36 = vadd.f32 (!%p519_p8), %v335_v35, %v324_v34 }
  0xd8   : > { %338 = vst.msk [vmem:[%s957_s30] sm:$0x3] %vm337_vm3, %v336_v36 }
  0xd9 PF: > { %s522_s24 = sshll.u32 %s769_s22, 1  ;;  %s360_s5 = sshll.u32 %s248_s23, 4  ;;  %s968_s5 = int_to_ptr.vmem [resolvable:$true] %s360_s5 }
  0xda   : > { %s356_s8 = sadd.s32 %s765_s21, %s522_s24  ;;  %s340_s0 = scalar_lea.sflag [#allocation3], %s246_s29 }
  0xdb   : > { %s523_s6 = sshll.u32 %s356_s8, 7  ;;  %s631_s1 = scalar_lea.vmem %s968_s5, 128 }
  0xdc   : > { %s358_s12 = scalar_lea.hbm %s1060_s3, %s523_s6  ;;  %p632_p9 = scmp.ne.s32.totalorder %s968_s5, %s631_s1 }
  0xdd   : > { %s785_s21 = smov [#allocation2]  }
  0xde   : > { %p633_p10 = pnand %p632_p9, %p885_p3  ;;  %s635_s28 = sshll.u32 %s785_s21, 4  ;;  %s636_s28 = int_to_ptr.vmem [resolvable:$false] %s635_s28 }
  0xdf   : > { %s637_s23 = scalar_lea.vmem %s636_s28, 256  ;;  %p638_p0 = scmp.lt.s32.totalorder %s968_s5, %s636_s28 }
  0xe0   : > { %p634_p11 = pneg %p633_p10  ;;  %p639_p1 = scmp.lt.s32.totalorder %s637_s23, %s631_s1 }
  0xe2   : > { %p640_p4 = por %p639_p1, %p638_p0 }
  0xe4   : > { %p641_p2 = pnand %p640_p4, %p634_p11 }
  0xe6   : > { %644 = shalt.err (!%p641_p2)
}
  0xe7   : > { %s645_s24 = scalar_lea.hbm %s358_s12, 128  ;;  %s649_s6 = scalar_lea.hbm %s1060_s3, 1024 }
  0xe8   : > { %p646_p5 = scmp.ne.s32.totalorder %s358_s12, %s645_s24  ;;  %p650_p9 = scmp.lt.u32.totalorder %s358_s12, %s1060_s3 }
  0xe9   : > { %p651_p10 = scmp.lt.u32.totalorder %s649_s6, %s645_s24  ;;  %p653_p7 = scmp.lt.u32.totalorder %s645_s24, %s358_s12 }
  0xea   : > { %p647_p6 = pnand %p646_p5, %p885_p3 }
  0xeb   : > { %p652_p13 = por %p651_p10, %p650_p9 }
  0xec   : > { %p648_p8 = pneg %p647_p6 }
  0xed   : > { %p654_p0 = por %p653_p7, %p652_p13 }
  0xef   : > { %p655_p11 = pnand %p654_p0, %p648_p8 }
  0xf1   : > { %658 = shalt.err (!%p655_p11)
}
  0xf2   : > { %527 = dma.vmem_to_hbm [thread:$0]  (%p885_p3), %s968_s5, 128, %s358_s12, %s340_s0  }
  0xf3   : > { %s524_s1 = sshll.u32 %s769_s22, 5  ;;  %s373_s21 = sshll.u32 %s957_s30, 4  ;;  %s374_s21 = int_to_ptr.vmem [resolvable:$true] %s373_s21 }
  0xf4   : > { %s996_s29 = scalar_lea.hbm %s1061_s4, %s524_s1  ;;  %s1081_s24 = sand.u32 1, %s745_s16  }
  0xf5   : > { %s345_s8 = scalar_lea.sflag [#allocation5], %s1081_s24  ;;  %s659_s6 = scalar_lea.vmem %s374_s21, 32 }
  0xf6   : > { %p660_p7 = scmp.ne.s32.totalorder %s374_s21, %s659_s6  ;;  %s786_s7 = smov [#allocation4]  }
  0xf7   : > { %s663_s9 = sshll.u32 %s786_s7, 4  ;;  %s664_s9 = int_to_ptr.vmem [resolvable:$false] %s663_s9 }
  0xf8   : > { %p661_p13 = pnand %p660_p7, %p912_p12  ;;  %s665_s11 = scalar_lea.vmem %s664_s9, 64 }
  0xf9   : > { %p666_p3 = scmp.lt.s32.totalorder %s374_s21, %s664_s9  ;;  %p667_p4 = scmp.lt.s32.totalorder %s665_s11, %s659_s6 }
  0xfa   : > { %p662_p1 = pneg %p661_p13 }
  0xfb   : > { %p668_p2 = por %p667_p4, %p666_p3 }
  0xfd   : > { %p669_p5 = pnand %p668_p2, %p662_p1 }
  0xff   : > { %672 = shalt.err (!%p669_p5)
}
 0x100   : > { %s673_s0 = scalar_lea.hbm %s996_s29, 32  ;;  %s677_s5 = scalar_lea.hbm %s1061_s4, 128 }
 0x101   : > { %p674_p6 = scmp.ne.s32.totalorder %s996_s29, %s673_s0  ;;  %p678_p10 = scmp.lt.u32.totalorder %s996_s29, %s1061_s4 }
 0x102   : > { %p679_p0 = scmp.lt.u32.totalorder %s677_s5, %s673_s0  ;;  %p681_p7 = scmp.lt.u32.totalorder %s673_s0, %s996_s29 }
 0x103   : > { %p675_p8 = pnand %p674_p6, %p912_p12 }
 0x104   : > { %p680_p11 = por %p679_p0, %p678_p10 }
 0x105   : > { %p676_p9 = pneg %p675_p8 }
 0x106   : > { %p682_p13 = por %p681_p7, %p680_p11 }
 0x108   : > { %p683_p1 = pnand %p682_p13, %p676_p9 }
 0x10a   : > { %686 = shalt.err (!%p683_p1)
}
 0x10b   : > { %528 = dma.vmem_to_hbm [thread:$0]  (%p912_p12), %s374_s21, 32, %s996_s29, %s345_s8  }
 0x10c PF: > { %p538_p3 = scmp.ge.s32.totalorder %s781_s25, 2  ;;  %s385_s28 = sand.u32 1, %s753_s18  }
 0x10d   : > { %p1082_p4 = scmp.ne.s32.totalorder %s1076_s10, 0  ;;  %s386_s23 = scalar_lea.sflag [#allocation3], %s385_s28 }
 0x10f   : > { %p532_p2 = pnand %p538_p3, %p1082_p4 }
 0x111   : > { %732 = dma.done.wait (!%p532_p2), %s386_s23, 128  }
 0x112   : > { %734 = vsyncadd (!%p532_p2), %s386_s23, 4294967168  ;;  %s394_s24 = sand.u32 1, %s741_s15   ;;  %p1083_p5 = scmp.ne.s32.totalorder %s1078_s27, 0 }
 0x113   : > { %s395_s6 = scalar_lea.sflag [#allocation5], %s394_s24 }
 0x114   : > { %p535_p6 = pnand %p538_p3, %p1083_p5 }
 0x116   : > { %736 = dma.done.wait (!%p535_p6), %s395_s6, 32  }
 0x117   : > { %738 = vsyncadd (!%p535_p6), %s395_s6, 4294967264  ;;  %s21_s25 = sadd.s32 1, %s781_s25   ;;  %s1084_s21 = sld [smem:[#allocation8_spill]] }
 0x118   : > { %p18_p12 = scmp.ge.s32.totalorder %s21_s25, 10   ;;  %s1085_s22 = sld [smem:[#allocation9_spill]] }
 0x119   : > { %s1086_s23 = sld [smem:[#allocation10_spill]]  ;;  %s1087_s24 = sld [smem:[#allocation11_spill]] }
 0x11a   : > { %s1088_s15 = smov %s745_s16  ;;  %s1089_s16 = smov %s749_s17 }
 0x11b   : > { %s1090_s17 = smov %s917_s14  ;;  %s1091_s18 = smov %s757_s19 }
 0x11c   : > { %s1092_s19 = smov %s761_s20  ;;  %s1093_s20 = smov %s920_s26 }
 0x11d   :  { %20 = sbr.rel (!%p18_p12) target bundleno = 12 (0xc), region = 98 }
 0x124   :  { %400 = vsyncpa [#allocation3], 1 }
 0x125   :  { %402 = vsyncpa [#allocation3 + $0x1], 1 }
 0x126   :  { %403 = vsyncpa [#allocation5], 1 }
 0x127   :  { %405 = vsyncpa [#allocation5 + $0x1], 1 }

</bundles_post_ra>
